<compile_context>
chip_gen: v7x
topology: tpu7x:2x2x1
jax: 0.10.0
libtpu: 0.0.40
codegen_flags: <defaults>
</compile_context>

<pallas_src>
import functools

import jax
import jax.numpy as jnp
import jax.scipy.stats
from jax.experimental import pallas as pl
from jax.experimental.pallas import tpu as pltpu


# ---------------------------------------------------------------------------
# Pallas kernel: one (batch, spatial-tile) block per grid step.
#   grid = (B, N // TILE_N);  axis 0 "parallel", axis 1 "arbitrary" (reduction)
# ---------------------------------------------------------------------------
def _entropy_kd_kernel(margin_ref, xs_ref, xt_ref, ent_ref, loss_ref, *,
                       inv_T, inv_N):
    b = pl.program_id(0)
    n = pl.program_id(1)

    m = margin_ref[b]                         # scalar per-batch margin (SMEM)

    xs = xs_ref[...].astype(jnp.float32)      # (1, C, TILE_N)
    xt = xt_ref[...].astype(jnp.float32)      # (1, C, TILE_N)

    # softmax(source / T, dim=channels)
    s = xs * inv_T
    s_max = jnp.max(s, axis=1, keepdims=True)
    e = jnp.exp(s - s_max)
    denom = jnp.sum(e, axis=1, keepdims=True)             # (1, 1, TILE_N)
    p = e * pl.reciprocal(denom, approx=False)

    # target = max(target / T, margin); log_softmax(target / T, dim=channels)
    t = jnp.maximum(xt * inv_T, m) * inv_T
    t_max = jnp.max(t, axis=1, keepdims=True)
    tz = t - t_max
    log_q = tz - jnp.log(jnp.sum(jnp.exp(tz), axis=1, keepdims=True))

    # entropy = softmax(source) * log_softmax(target)
    ent = p * log_q
    ent_ref[...] = ent.astype(ent_ref.dtype)

    # per-batch loss contribution of this spatial tile:
    #   mean over spatial of (-sum over channels)  ==  -sum(ent) / N
    partial = -jnp.sum(ent) * inv_N

    @pl.when(n == 0)
    def _():
        loss_ref[...] = jnp.zeros_like(loss_ref)

    loss_ref[...] += partial


# ---------------------------------------------------------------------------
# get_margin_from_BN — per-batch margin from mean/std of the target tensor.
# (Host/glue computation in the original PyTorch code: .cpu() + scipy.)
# ---------------------------------------------------------------------------
def _margin_from_bn(xt_bcn):
    B = xt_bcn.shape[0]
    flat = xt_bcn.reshape(B, -1).astype(jnp.float32)
    mean = jnp.mean(flat, axis=-1)
    std = jnp.std(flat, axis=-1, ddof=1)       # torch .std() is unbiased
    ss = jnp.abs(std)
    mm = mean
    cdf = jax.scipy.stats.norm.cdf(-mm / ss)
    cdf_safe = jnp.where(cdf > 0.001, cdf, 1.0)
    margin_a = (-ss * jnp.exp(-(mm / ss) ** 2 / 2.0)
                / jnp.sqrt(2.0 * jnp.pi) / cdf_safe + mm)
    margin_b = -3.0 * ss
    return jnp.where(cdf > 0.001, margin_a, margin_b)      # (B,)


# ---------------------------------------------------------------------------
# VMEM-aware spatial tile selection: largest multiple of 128 dividing N whose
# (2 inputs + 1 ent output) single-buffer footprint stays under `budget`
# (~2 MiB -> ~4 MiB double-buffered; safe on v5e 16 MiB / v7x 64 MiB limits).
# ---------------------------------------------------------------------------
def _choose_tile_n(N, C, in_itemsize, out_itemsize, budget=2 * 1024 * 1024):
    per_col = C * (2 * in_itemsize + out_itemsize)
    if N < 128 or N * per_col <= budget:
        return N
    t = min(N, (budget // per_col) // 128 * 128)
    while t >= 128:
        if N % t == 0:
            return t
        t -= 128
    return N   # no 128-multiple divisor fits; fall back to one full block


# ---------------------------------------------------------------------------
# Wrapper mirroring EntropyKD.forward(x_s, x_t, x_ts, x_st, i).
# ---------------------------------------------------------------------------
def entropy_kd_forward(x_s, x_t, x_ts, x_st, i, T=1.0, tile_n=None):
    del x_s, x_t  # unused by the PyTorch forward as well
    B, C, H, W = x_ts.shape
    N = H * W

    # Keep native dtype (no f32 upcast in HBM); kernel casts after load.
    xs = x_ts.reshape(B, C, N)
    xt = x_st.reshape(B, C, N)
    margin = _margin_from_bn(xt).astype(jnp.float32)       # (B,) -> SMEM

    if tile_n is None:
        tile_n = _choose_tile_n(N, C, xs.dtype.itemsize, xs.dtype.itemsize)
    assert N % tile_n == 0, (N, tile_n)
    num_n = N // tile_n

    kernel = functools.partial(_entropy_kd_kernel,
                               inv_T=1.0 / float(T), inv_N=1.0 / float(N))

    ent, loss_b = pl.pallas_call(
        kernel,
        out_shape=(
            jax.ShapeDtypeStruct((B, C, N), xs.dtype),      # entropy (xts_ent)
            jax.ShapeDtypeStruct((B, 1, 1), jnp.float32),   # per-batch loss
        ),
        grid=(B, num_n),
        in_specs=[
            pl.BlockSpec(memory_space=pltpu.MemorySpace.SMEM),      # margin (B,)
            pl.BlockSpec((1, C, tile_n), lambda b, n: (b, 0, n)),   # xs
            pl.BlockSpec((1, C, tile_n), lambda b, n: (b, 0, n)),   # xt
        ],
        out_specs=(
            pl.BlockSpec((1, C, tile_n), lambda b, n: (b, 0, n)),   # entropy
            pl.BlockSpec((1, 1, 1), lambda b, n: (b, 0, 0)),        # loss acc
        ),
        compiler_params=pltpu.CompilerParams(
            # batch axis shardable across TensorCores (v7x); spatial-tile axis
            # is the accumulation axis for the per-batch loss.
            dimension_semantics=("parallel", "arbitrary")),
    )(margin, xs, xt)

    loss = jnp.mean(loss_b[:, 0, 0])
    # TODO(synk): wandb.log(f'lay_dist/layer_{i}') is a logging side-effect; skipped.
    return loss, ent


# ---------------------------------------------------------------------------
# Pure-JAX reference for correctness checking.
# ---------------------------------------------------------------------------
def entropy_kd_ref(x_ts, x_st, T=1.0):
    B, C, H, W = x_ts.shape
    xs = x_ts.reshape(B, C, -1).astype(jnp.float32)
    xt = x_st.reshape(B, C, -1).astype(jnp.float32)
    margin = _margin_from_bn(xt)
    target = jnp.maximum(xt / T, margin.reshape(B, 1, 1))
    ent = jax.nn.softmax(xs / T, axis=1) * jax.nn.log_softmax(target / T, axis=1)
    ch_ent = -jnp.sum(ent, axis=1)
    batch_mean = jnp.mean(ch_ent, axis=1)
    return jnp.mean(batch_mean), ent


if __name__ == "__main__":
    key = jax.random.PRNGKey(0)
    k1, k2, k3, k4 = jax.random.split(key, 4)

    # Case 1: small module-consistent shape (single spatial tile per batch).
    B, C, H, W = 2, 4, 16, 16
    x_s = jax.random.normal(k1, (B, C, H, W), jnp.float32)   # unused by forward
    x_t = jax.random.normal(k2, (B, C, H, W), jnp.float32)   # unused by forward
    x_ts = jax.random.normal(k3, (B, C, H, W), jnp.float32)
    x_st = jax.random.normal(k4, (B, C, H, W), jnp.float32)

    loss, ent = entropy_kd_forward(x_s, x_t, x_ts, x_st, i=0, T=1.0)
    jax.block_until_ready((loss, ent))

    loss_ref, ent_ref = entropy_kd_ref(x_ts, x_st, T=1.0)
    assert jnp.allclose(loss, loss_ref, rtol=1e-3, atol=1e-4), (loss, loss_ref)
    assert jnp.allclose(ent, ent_ref, rtol=1e-3, atol=1e-4)

    # Case 2: force the multi-tile spatial path (N=512, TILE_N=128) to
    # validate the per-batch loss accumulation across spatial tiles.
    B2, C2, H2, W2 = 2, 8, 16, 32
    y_ts = jax.random.normal(jax.random.PRNGKey(1), (B2, C2, H2, W2), jnp.float32)
    y_st = jax.random.normal(jax.random.PRNGKey(2), (B2, C2, H2, W2), jnp.float32)
    loss2, ent2 = entropy_kd_forward(y_ts, y_ts, y_ts, y_st, i=1, T=2.0, tile_n=128)
    jax.block_until_ready((loss2, ent2))
    loss2_ref, ent2_ref = entropy_kd_ref(y_ts, y_st, T=2.0)
    assert jnp.allclose(loss2, loss2_ref, rtol=1e-3, atol=1e-4), (loss2, loss2_ref)
    assert jnp.allclose(ent2, ent2_ref, rtol=1e-3, atol=1e-4)

    print("KERNEL_OK")
</pallas_src>

<mosaic_0001>
module attributes {stable_mosaic.version = 11 : i64} {
  func.func @_entropy_kd_kernel(%arg0: i32, %arg1: i32, %arg2: memref<2xf32, #tpu.memory_space<smem>>, %arg3: memref<1x4x256xf32, #tpu.memory_space<vmem>>, %arg4: memref<1x4x256xf32, #tpu.memory_space<vmem>>, %arg5: memref<1x4x256xf32, #tpu.memory_space<vmem>>, %arg6: memref<1x1x1xf32, #tpu.memory_space<vmem>>) attributes {dimension_semantics = [#tpu.dimension_semantics<parallel>, #tpu.dimension_semantics<arbitrary>], iteration_bounds = array<i64: 2, 1>, scalar_prefetch = 0 : i64, scratch_operands = 0 : i64, tpu.core_type = #tpu.core_type<tc>, window_params = [{transform_indices = @transform_0, window_bounds = array<i64: 2>}, {transform_indices = @transform_1, window_bounds = array<i64: 1, 4, 256>}, {transform_indices = @transform_2, window_bounds = array<i64: 1, 4, 256>}, {transform_indices = @transform_3, window_bounds = array<i64: 1, 4, 256>}, {transform_indices = @transform_4, window_bounds = array<i64: 1, 1, 1>}]} {
    %0 = arith.index_cast %arg0 : i32 to index
    %1 = memref.load %arg2[%0] : memref<2xf32, #tpu.memory_space<smem>>
    %c0 = arith.constant 0 : index
    %c0_0 = arith.constant 0 : index
    %c0_1 = arith.constant 0 : index
    %2 = vector.load %arg3[%c0, %c0_0, %c0_1] : memref<1x4x256xf32, #tpu.memory_space<vmem>>, vector<1x4x256xf32>
    %c0_2 = arith.constant 0 : index
    %c0_3 = arith.constant 0 : index
    %c0_4 = arith.constant 0 : index
    %3 = vector.load %arg4[%c0_2, %c0_3, %c0_4] : memref<1x4x256xf32, #tpu.memory_space<vmem>>, vector<1x4x256xf32>
    %cst = arith.constant 1.000000e+00 : f32
    %4 = vector.broadcast %cst : f32 to vector<1x4x256xf32>
    %5 = arith.mulf %2, %4 : vector<1x4x256xf32>
    %cst_5 = arith.constant dense<0xFF800000> : vector<1x256xf32>
    %6 = vector.multi_reduction <maximumf>, %5, %cst_5 [1] : vector<1x4x256xf32> to vector<1x256xf32>
    %7 = vector.shape_cast %6 : vector<1x256xf32> to vector<1x1x256xf32>
    %8 = vector.broadcast %7 : vector<1x1x256xf32> to vector<1x4x256xf32>
    %9 = arith.subf %5, %8 : vector<1x4x256xf32>
    %10 = math.exp %9 : vector<1x4x256xf32>
    %cst_6 = arith.constant dense<0.000000e+00> : vector<1x256xf32>
    %11 = vector.multi_reduction <add>, %10, %cst_6 [1] : vector<1x4x256xf32> to vector<1x256xf32>
    %12 = vector.shape_cast %11 : vector<1x256xf32> to vector<1x1x256xf32>
    %13 = tpu.reciprocal %12 : vector<1x1x256xf32> -> vector<1x1x256xf32>
    %14 = vector.broadcast %13 : vector<1x1x256xf32> to vector<1x4x256xf32>
    %15 = arith.mulf %10, %14 : vector<1x4x256xf32>
    %cst_7 = arith.constant 1.000000e+00 : f32
    %16 = vector.broadcast %cst_7 : f32 to vector<1x4x256xf32>
    %17 = arith.mulf %3, %16 : vector<1x4x256xf32>
    %18 = vector.broadcast %1 : f32 to vector<1x4x256xf32>
    %19 = arith.maximumf %17, %18 : vector<1x4x256xf32>
    %cst_8 = arith.constant 1.000000e+00 : f32
    %20 = vector.broadcast %cst_8 : f32 to vector<1x4x256xf32>
    %21 = arith.mulf %19, %20 : vector<1x4x256xf32>
    %cst_9 = arith.constant dense<0xFF800000> : vector<1x256xf32>
    %22 = vector.multi_reduction <maximumf>, %21, %cst_9 [1] : vector<1x4x256xf32> to vector<1x256xf32>
    %23 = vector.shape_cast %22 : vector<1x256xf32> to vector<1x1x256xf32>
    %24 = vector.broadcast %23 : vector<1x1x256xf32> to vector<1x4x256xf32>
    %25 = arith.subf %21, %24 : vector<1x4x256xf32>
    %26 = math.exp %25 : vector<1x4x256xf32>
    %cst_10 = arith.constant dense<0.000000e+00> : vector<1x256xf32>
    %27 = vector.multi_reduction <add>, %26, %cst_10 [1] : vector<1x4x256xf32> to vector<1x256xf32>
    %28 = vector.shape_cast %27 : vector<1x256xf32> to vector<1x1x256xf32>
    %29 = math.log %28 : vector<1x1x256xf32>
    %30 = vector.broadcast %29 : vector<1x1x256xf32> to vector<1x4x256xf32>
    %31 = arith.subf %25, %30 : vector<1x4x256xf32>
    %32 = arith.mulf %15, %31 : vector<1x4x256xf32>
    %c0_11 = arith.constant 0 : index
    %c0_12 = arith.constant 0 : index
    %c0_13 = arith.constant 0 : index
    %33 = vector.load %arg5[%c0_11, %c0_12, %c0_13] : memref<1x4x256xf32, #tpu.memory_space<vmem>>, vector<1x4x256xf32>
    tpu.vector_store %arg5[%c0_11, %c0_12, %c0_13], %32 {strides = array<i32>} : memref<1x4x256xf32, #tpu.memory_space<vmem>>, vector<1x4x256xf32>,
    %34 = vector.shape_cast %32 : vector<1x4x256xf32> to vector<1x1x4x256xf32>
    %cst_14 = arith.constant dense<0.000000e+00> : vector<1xf32>
    %35 = vector.multi_reduction <add>, %34, %cst_14 [1, 2, 3] : vector<1x1x4x256xf32> to vector<1xf32>
    %36 = vector.shape_cast %35 : vector<1xf32> to vector<1x1x1x1xf32>
    %37 = vector.extract %36[0, 0, 0, 0] : f32 from vector<1x1x1x1xf32>
    %cst_15 = arith.constant 0.000000e+00 : f32
    %38 = arith.subf %cst_15, %37 : f32
    %cst_16 = arith.constant 3.906250e-03 : f32
    %39 = arith.mulf %38, %cst_16 : f32
    %c0_i32 = arith.constant 0 : i32
    %40 = arith.cmpi eq, %arg1, %c0_i32 : i32
    %41 = arith.extui %40 : i1 to i32
    %c0_i32_17 = arith.constant 0 : i32
    %42 = arith.cmpi ne, %41, %c0_i32_17 : i32
    scf.if %42 {
      %cst_24 = arith.constant 0.000000e+00 : f32
      %47 = vector.broadcast %cst_24 : f32 to vector<1x1x1xf32>
      %c0_25 = arith.constant 0 : index
      %c0_26 = arith.constant 0 : index
      %c0_27 = arith.constant 0 : index
      %48 = vector.load %arg6[%c0_25, %c0_26, %c0_27] : memref<1x1x1xf32, #tpu.memory_space<vmem>>, vector<1x1x1xf32>
      tpu.vector_store %arg6[%c0_25, %c0_26, %c0_27], %47 {strides = array<i32>} : memref<1x1x1xf32, #tpu.memory_space<vmem>>, vector<1x1x1xf32>,
    } else {
    }
    %c0_18 = arith.constant 0 : index
    %c0_19 = arith.constant 0 : index
    %c0_20 = arith.constant 0 : index
    %43 = vector.load %arg6[%c0_18, %c0_19, %c0_20] : memref<1x1x1xf32, #tpu.memory_space<vmem>>, vector<1x1x1xf32>
    %44 = vector.broadcast %39 : f32 to vector<1x1x1xf32>
    %45 = arith.addf %43, %44 : vector<1x1x1xf32>
    %c0_21 = arith.constant 0 : index
    %c0_22 = arith.constant 0 : index
    %c0_23 = arith.constant 0 : index
    %46 = vector.load %arg6[%c0_21, %c0_22, %c0_23] : memref<1x1x1xf32, #tpu.memory_space<vmem>>, vector<1x1x1xf32>
    tpu.vector_store %arg6[%c0_21, %c0_22, %c0_23], %45 {strides = array<i32>} : memref<1x1x1xf32, #tpu.memory_space<vmem>>, vector<1x1x1xf32>,
    return
  }
  func.func @transform_0(%arg0: i32, %arg1: i32) -> i32 {
    %c0_i32 = arith.constant 0 : i32
    %c0_i32_0 = arith.constant 0 : i32
    return %c0_i32 : i32
  }
  func.func @transform_1(%arg0: i32, %arg1: i32) -> (i32, i32, i32) {
    %c0_i32 = arith.constant 0 : i32
    %c0_i32_0 = arith.constant 0 : i32
    return %arg0, %c0_i32, %arg1 : i32, i32, i32
  }
  func.func @transform_2(%arg0: i32, %arg1: i32) -> (i32, i32, i32) {
    %c0_i32 = arith.constant 0 : i32
    %c0_i32_0 = arith.constant 0 : i32
    return %arg0, %c0_i32, %arg1 : i32, i32, i32
  }
  func.func @transform_3(%arg0: i32, %arg1: i32) -> (i32, i32, i32) {
    %c0_i32 = arith.constant 0 : i32
    %c0_i32_0 = arith.constant 0 : i32
    return %arg0, %c0_i32, %arg1 : i32, i32, i32
  }
  func.func @transform_4(%arg0: i32, %arg1: i32) -> (i32, i32, i32) {
    %c0_i32 = arith.constant 0 : i32
    %c0_i32_0 = arith.constant 0 : i32
    %c0_i32_1 = arith.constant 0 : i32
    return %arg0, %c0_i32, %c0_i32_0 : i32, i32, i32
  }
}

</mosaic_0001>

<bundles_post_ra>
// kernel: tpu_custom_call.1
= control target key start
LH: loop header
LB: loop body
LE: loop exit
PB: predicated region body
PF: predicated region fallthrough
CT: control target
= control target key end

     0   :  { %s1191_s0 = inlined_call_operand.hbm [shape: f32[2], index: 0, kind: input, shape index: {}]   ;;  %s1192_s1 = inlined_call_operand.hbm [shape: f32[2,4,256], index: 1, kind: input, shape index: {}]   ;;  %s1193_s2 = inlined_call_operand.hbm [shape: f32[2,4,256], index: 2, kind: input, shape index: {}]   ;;  %s1194_s3 = inlined_call_operand.hbm [shape: f32[2,4,256], index: 3, kind: output, shape index: {0}]   ;;  %s1195_s4 = inlined_call_operand.vmem [shape: f32[2,1,1], index: 4, kind: output, shape index: {1}]  }
   0x1   :  { %1203 = sst [smem:[#allocation15_spill]] %s1191_s0 }
   0x2   :  { %1204 = sst [smem:[#allocation16_spill]] %s1192_s1 }
   0x3   :  { %10 = vsyncpa [#allocation5], 0 }
   0x4   :  { %11 = vsyncpa [#allocation3], 0 }
   0x5   :  { %13 = vsyncpa [#allocation3 + $0x1], 0 }
   0x6   :  { %14 = vsyncpa [#allocation8], 0 }
   0x7   :  { %16 = vsyncpa [#allocation8 + $0x1], 0 }
   0x8   :  { %17 = vsyncpa [#allocation4], 0 }
   0x9   :  { %19 = vsyncpa [#allocation4 + $0x1], 0  ;;  %s909_s15 = smov 0   ;;  %s911_s16 = smov 0  }
   0xa   :  { %s913_s17 = smov 0   ;;  %s915_s18 = smov 0  }
   0xb   :  { %s917_s19 = smov 0   ;;  %s919_s20 = smov 0  }
   0xc LB: > { %s596_s21 = sadd.s32 4294967295, %s877_s20   ;;  %s597_s22 = sadd.s32 4294967294, %s877_s20   ;;  %s877_s20 = sphi %s919_s20, %s25_s20   ;;  %s873_s19 = sphi %s917_s19, %s1229_s19   ;;  %s869_s18 = sphi %s915_s18, %s1228_s18   ;;  %s865_s17 = sphi %s913_s17, %s1227_s17   ;;  %s861_s16 = sphi %s911_s16, %s1226_s16   ;;  %s857_s15 = sphi %s909_s15, %s1225_s15  }
   0xd   : > { %p74_p0 = scmp.ne.s32.totalorder %s865_s17, %s861_s16  ;;  %p80_p1 = scmp.ne.s32.totalorder %s861_s16, %s857_s15 }
   0xe   : > { %p945_p2 = scmp.eq.s32.totalorder %s596_s21, 0  ;;  %p134_p3 = scmp.eq.s32.totalorder %s596_s21, 1 }
   0xf   : > { %p140_p4 = scmp.eq.s32.totalorder %s597_s22, 1  ;;  %p598_p5 = scmp.ge.s32.totalorder %s877_s20, 1 }
  0x10   : > { %s1205_s23 = scalar_select %p945_p2, 1, 0 }
  0x11   : > { %p952_p6 = por %p945_p2, %p80_p1  ;;  %p959_p7 = por %p134_p3, %p74_p0 }
  0x12   : > { %p963_p8 = por %p140_p4, %p80_p1  ;;  %p173_p9 = scmp.lt.s32.totalorder %s877_s20, 3 }
  0x13   : > { %s1206_s24 = scalar_select %p952_p6, 1, 0 }
  0x14   : > { %s1207_s25 = scalar_select %p959_p7, 1, 0 }
  0x15   : > { %s1208_s26 = scalar_select %p963_p8, 1, 0 }
  0x16   : > { %p968_p10 = pnand %p598_p5, %p173_p9  ;;  %s67_s28 = sadd.s32 1, %s865_s17 }
  0x17   : > { %s37_s29 = sadd.s32 1, %s873_s19  ;;  %p75_p13 = scmp.eq.s32.totalorder %s877_s20, 0 }
  0x18   : > { %s1209_s27 = scalar_select %p968_p10, 1, 0 }
  0x19   : > { %p632_p12 = pneg %p968_p10  ;;  %p984_p1 = scmp.ge.s32.totalorder %s37_s29, 2 }
  0x1a   : > { %p991_p4 = por %p75_p13, %p74_p0  ;;  %p648_p5 = scmp.lt.s32.totalorder %s877_s20, 2 }
  0x1b   : > { %p980_p3 = pnand %p632_p12, %p945_p2  ;;  %s997_s7 = sand.u32 1, %s865_s17  }
  0x1c   : > { %s1213_s0 = sld [smem:[#allocation15_spill]] }
  0x1d   : > { %p716_p12 = pneg %p980_p3 }
  0x22   : > { %s714_s10 = scalar_lea.hbm %s1213_s0, 16 }
  0x23   : > { %p715_p9 = scmp.ne.s32.totalorder %s1213_s0, %s714_s10  ;;  %p721_p0 = scmp.lt.u32.totalorder %s714_s10, %s1213_s0 }
  0x25   : > { %p717_p11 = pnand %p716_p12, %p715_p9 }
  0x27   : > { %p718_p8 = pneg %p717_p11 }
  0x29   : > { %p723_p13 = pnand %p721_p0, %p718_p8 }
  0x2b   : > { %726 = shalt.err (!%p723_p13)
}
  0x2c   : > { %s879_s21 = smov [#allocation2]   ;;  %s1231_s29 = smov (%p984_p1, %s37_s29), 0 }
  0x2d   : > { %635 = dma.hbm_to_smem (!%p980_p3), %s1213_s0, 16, %s879_s21, [#allocation5]  }
  0x2e   : > { %1214 = sst [smem:[#allocation14_spill]] %s1231_s29  ;;  %s1196_s9 = sshll.u32 %s997_s7, 3 }
  0x2f   : > { %s62_s10 = ssub.s32 %s873_s19, %s1231_s29  ;;  %s617_s30 = sshll.u32 %s873_s19, 7 }
  0x30   : > { %p65_p8 = scmp.eq.s32.totalorder %s62_s10, 0  ;;  %s1215_s1 = sld [smem:[#allocation16_spill]] }
  0x31   : > { %s199_s14 = scalar_lea.vmem [#allocation6], %s1196_s9  ;;  %p1039_p11 = pnand %p648_p5, %p991_p4 }
  0x32   : > { %s209_s21 = sshll.u32 %s199_s14, 4  ;;  %s1046_s11 = scalar_lea.hbm %s1193_s2, %s617_s30  ;;  %s1033_s21 = int_to_ptr.vmem [resolvable:$true] %s209_s21 }
  0x33   : > { %s1031_s5 = scalar_select %p65_p8, %s865_s17, %s67_s28  }
  0x34   : > { %s196_s12 = scalar_lea.sflag [#allocation3], %s997_s7  ;;  %p729_p1 = pneg %p1039_p11 }
  0x36   : > { %s1026_s13 = scalar_lea.hbm %s1215_s1, %s617_s30  ;;  %s732_s14 = scalar_lea.hbm %s1215_s1, 256 }
  0x37   : > { %s727_s9 = scalar_lea.hbm %s1026_s13, 128  ;;  %p733_p4 = scmp.lt.u32.totalorder %s1026_s13, %s1215_s1 }
  0x38   : > { %p728_p3 = scmp.ne.s32.totalorder %s1026_s13, %s727_s9  ;;  %p734_p5 = scmp.lt.u32.totalorder %s732_s14, %s727_s9 }
  0x39   : > { %p736_p13 = scmp.lt.u32.totalorder %s727_s9, %s1026_s13 }
  0x3a   : > { %p730_p9 = pnand %p729_p1, %p728_p3  ;;  %p735_p0 = por %p734_p5, %p733_p4 }
  0x3c   : > { %p731_p12 = pneg %p730_p9  ;;  %p737_p8 = por %p736_p13, %p735_p0 }
  0x3e   : > { %p738_p7 = pnand %p737_p8, %p731_p12 }
  0x40   : > { %741 = shalt.err (!%p738_p7)
}
  0x41   : > { %s742_s30 = scalar_lea.vmem %s1033_s21, 128  ;;  %s880_s8 = smov [#allocation6]  }
  0x42   : > { %p743_p3 = scmp.ne.s32.totalorder %s1033_s21, %s742_s30  ;;  %s747_s10 = sshll.u32 %s880_s8, 4  ;;  %s748_s10 = int_to_ptr.vmem [resolvable:$false] %s747_s10 }
  0x43   : > { %s749_s0 = scalar_lea.vmem %s748_s10, 256  ;;  %p750_p2 = scmp.lt.s32.totalorder %s1033_s21, %s748_s10 }
  0x44   : > { %p745_p9 = pnand %p743_p3, %p729_p1  ;;  %p751_p4 = scmp.lt.s32.totalorder %s749_s0, %s742_s30 }
  0x46   : > { %p746_p6 = pneg %p745_p9  ;;  %p752_p5 = por %p751_p4, %p750_p2 }
  0x48   : > { %p753_p0 = pnand %p752_p5, %p746_p6 }
  0x4a   : > { %756 = shalt.err (!%p753_p0)
}
  0x4b   : > { %639 = dma.hbm_to_vmem [thread:$0]  (!%p1039_p11), %s1026_s13, 128, %s1033_s21, %s196_s12  }
  0x4c   : > { %s1217_s29 = sshll.u32 %s997_s7, 3  ;;  %s217_s6 = scalar_lea.sflag [#allocation8], %s997_s7 }
  0x4d   : > { %s220_s9 = scalar_lea.vmem [#allocation7], %s1217_s29  ;;  %s757_s14 = scalar_lea.hbm %s1046_s11, 128 }
  0x4e   : > { %s230_s28 = sshll.u32 %s220_s9, 4  ;;  %p758_p2 = scmp.ne.s32.totalorder %s1046_s11, %s757_s14  ;;  %s231_s28 = int_to_ptr.vmem [resolvable:$true] %s230_s28 }
  0x4f   : > { %s762_s10 = scalar_lea.hbm %s1193_s2, 256  ;;  %p763_p12 = scmp.lt.u32.totalorder %s1046_s11, %s1193_s2 }
  0x50   : > { %p760_p6 = pnand %p758_p2, %p729_p1  ;;  %p764_p13 = scmp.lt.u32.totalorder %s762_s10, %s757_s14 }
  0x51   : > { %p766_p3 = scmp.lt.u32.totalorder %s757_s14, %s1046_s11 }
  0x52   : > { %p761_p7 = pneg %p760_p6  ;;  %p765_p8 = por %p764_p13, %p763_p12 }
  0x54   : > { %p767_p9 = por %p766_p3, %p765_p8 }
  0x56   : > { %p768_p4 = pnand %p767_p9, %p761_p7 }
  0x58   : > { %771 = shalt.err (!%p768_p4)
}
  0x59   : > { %s772_s7 = scalar_lea.vmem %s231_s28, 128  ;;  %s881_s13 = smov [#allocation7]  }
  0x5a   : > { %p773_p5 = scmp.ne.s32.totalorder %s231_s28, %s772_s7  ;;  %s777_s21 = sshll.u32 %s881_s13, 4  ;;  %s778_s21 = int_to_ptr.vmem [resolvable:$false] %s777_s21 }
  0x5b   : > { %s779_s12 = scalar_lea.vmem %s778_s21, 256  ;;  %p780_p6 = scmp.lt.s32.totalorder %s231_s28, %s778_s21 }
  0x5c   : > { %p775_p0 = pnand %p773_p5, %p729_p1  ;;  %p781_p10 = scmp.lt.s32.totalorder %s779_s12, %s772_s7 }
  0x5e   : > { %p776_p2 = pneg %p775_p0  ;;  %p782_p12 = por %p781_p10, %p780_p6 }
  0x60   : > { %p783_p13 = pnand %p782_p12, %p776_p2 }
  0x62   : > { %786 = shalt.err (!%p783_p13)
}
  0x63   : > { %642 = dma.hbm_to_vmem [thread:$0]  (!%p1039_p11), %s1046_s11, 128, %s231_s28, %s217_s6  }
  0x64   : > { %p1218_p7 = scmp.ne.s32.totalorder %s1209_s27, 0 }
  0x65   : > { %p1219_p8 = scmp.ne.s32.totalorder (!%p1218_p7), %s1205_s23, 0 }
  0x66   : > { %239 = sbr.rel (%p1218_p7) target bundleno = 410 (0x19a), region = 32 }
  0x6d   : > { %840 = dma.done.wait (%p1219_p8), [#allocation5], 16  }
  0x6e   : > { %842 = vsyncadd (%p1219_p8), [#allocation5], 4294967280  ;;  %s1103_s1 = sand.u32 1, %s861_s16   ;;  %p1220_p10 = scmp.ne.s32.totalorder %s1206_s24, 0 }
  0x6f   : > { %s1106_s29 = sshll.u32 %s1103_s1, 3  ;;  %s246_s22 = scalar_lea.sflag [#allocation3], %s1103_s1 }
  0x70   : > { %s249_s11 = scalar_lea.vmem [#allocation6], %s1106_s29 }
  0x71   : > { %844 = dma.done.wait (%p1220_p10), %s246_s22, 128  }
  0x72   : > { %846 = vsyncadd (%p1220_p10), %s246_s22, 4294967168  ;;  %s255_s23 = scalar_lea.sflag [#allocation8], %s1103_s1  ;;  %s258_s27 = scalar_lea.vmem [#allocation7], %s1106_s29 }
  0x73   : > { %848 = dma.done.wait (%p1220_p10), %s255_s23, 128  }
  0x74   : > { %850 = vsyncadd (%p1220_p10), %s255_s23, 4294967168 }
  0x75   : > { %263 = sfence }
  0x76   : > { %s298_s9 = sld [smem:[#allocation2 + %s869_s18]]  ;;  %v299_v0 = vld [vmem:[%s249_s11] sm:$0xff]  ;;  %vm304_vm0 = vcmask 1043456   ;;  %v300_v5 = vld [vmem:[%s258_s27] sm:$0xff]  ;;  %p295_p11 = scmp.lt.s32.totalorder %s869_s18, 1  ;;  %vm425_vm1 = vcmask 0  }
  0x77   : > { %v302_v1 = vcombine.high %v299_v0, %v299_v0  ;;  %v305_v2 = vsel %vm304_vm0, %v299_v0, -inf  ;;  %s286_s30 = scalar_lea.vmem [#allocation9], %s1106_s29  ;;  %s619_s8 = sshll.u32 %s869_s18, 7 }
  0x78   : > { %v306_v3 = vrot.slane %v305_v2, 4  ;;  %s296_s24 = scalar_select %p295_p11, %s869_s18, 1 }
  0x79   : > { %v312_v4 = vsel %vm304_vm0, %v302_v1, -inf  ;;  %s452_s10 = sshll.u32 %s286_s30, 4  ;;  %s1145_s13 = scalar_lea.hbm %s1194_s3, %s619_s8  ;;  %s453_s10 = int_to_ptr.vmem [resolvable:$true] %s452_s10 }
  0x7a   : > { %v307_v6 = vmax.f32 %v305_v2, %v306_v3  ;;  %v313_v7 = vrot.slane %v312_v4, 4  ;;  %s1136_s14 = scalar_lea.vmem %s1195_s4, %s296_s24  ;;  %s433_s21 = scalar_lea.sflag [#allocation4], %s1103_s1 }
  0x7b   : > { %s787_s12 = scalar_lea.vmem %s453_s10, 128  ;;  %p1221_p3 = scmp.ne.s32.totalorder %s1207_s25, 0 }
  0x7c   : > { %v308_v8 = vrot.slane %v307_v6, 2  ;;  %v314_v9 = vmax.f32 %v312_v4, %v313_v7  ;;  %v350_v10 = vstv %s298_s9  ;;  %p788_p1 = scmp.ne.s32.totalorder %s453_s10, %s787_s12  ;;  %s883_s22 = smov [#allocation9]  }
  0x7d   : > { %v351_v11 = vmax.f32 %v300_v5, %v350_v10  ;;  %s791_s11 = sshll.u32 %s883_s22, 4  ;;  %s792_s11 = int_to_ptr.vmem [resolvable:$false] %s791_s11 }
  0x7e   : > { %v309_v12 = vmax.f32 %v307_v6, %v308_v8  ;;  %v315_v13 = vrot.slane %v314_v9, 2  ;;  %p789_p9 = pnand %p788_p1, %p1221_p3  ;;  %s793_s23 = scalar_lea.vmem %s792_s11, 256 }
  0x7f   : > { %v353_v14 = vcombine.high %v351_v11, %v351_v11  ;;  %v355_v15 = vsel %vm304_vm0, %v351_v11, -inf  ;;  %p794_p5 = scmp.lt.s32.totalorder %s453_s10, %s792_s11  ;;  %p795_p0 = scmp.lt.s32.totalorder %s793_s23, %s787_s12 }
  0x80   : > { %v310_v16 = vrot.slane %v309_v12, 1  ;;  %v316_v17 = vmax.f32 %v314_v9, %v315_v13  ;;  %v356_v18 = vrot.slane %v355_v15, 4  ;;  %p790_p4 = pneg %p789_p9 }
  0x81   : > { %v362_v19 = vsel %vm304_vm0, %v353_v14, -inf  ;;  %p796_p2 = por %p795_p0, %p794_p5 }
  0x82   : > { %v311_v20 = vmax.f32 %v309_v12, %v310_v16  ;;  %v317_v21 = vrot.slane %v316_v17, 1  ;;  %v357_v22 = vmax.f32 %v355_v15, %v356_v18  ;;  %v363_v23 = vrot.slane %v362_v19, 4 }
  0x83   : > { %p797_p6 = pnand %p796_p2, %p790_p4 }
  0x84   : > { %v318_v24 = vmax.f32 %v316_v17, %v317_v21  ;;  %v358_v25 = vrot.slane %v357_v22, 2  ;;  %v364_v26 = vmax.f32 %v362_v19, %v363_v23  ;;  %v882_v23 = vmov 0.0  }
  0x85   : > { %426 = vst.msk [vmem:[%s1136_s14] sm:$0x1] %vm425_vm1, %v882_v23 }
  0x86   : > { %v321_v27 = vcombine.low %v311_v20, %v318_v24  ;;  %v359_v28 = vmax.f32 %v357_v22, %v358_v25  ;;  %v365_v29 = vrot.slane %v364_v26, 2 }
  0x88   : > { %v323_v30 = vsub.f32 %v299_v0, %v321_v27  ;;  %v360_v31 = vrot.slane %v359_v28, 1  ;;  %v366_v32 = vmax.f32 %v364_v26, %v365_v29 }
  0x8a   : > { %v324_v33 = vmul.f32 1.442695, %v323_v30  ;;  %v361_v34 = vmax.f32 %v359_v28, %v360_v31  ;;  %v367_v35 = vrot.slane %v366_v32, 1 }
  0x8c   : > { %702 = vpow2.f32 %v324_v33  ;;  %v368_v36 = vmax.f32 %v366_v32, %v367_v35 }
  0x8e   : > { %v371_v37 = vcombine.low %v361_v34, %v368_v36 }
  0x90   : > { %v373_v38 = vsub.f32 %v351_v11, %v371_v37 }
  0x92   : > { %v374_v39 = vmul.f32 1.442695, %v373_v38 }
  0x94   : > { %704 = vpow2.f32 %v374_v39 }
  0x96   : > { %v703_v40 = vpop.eup %702 }
  0x97   : > { %v327_v41 = vcombine.high %v703_v40, %v703_v40  ;;  %v329_v42 = vsel %vm304_vm0, %v703_v40, 0.0 }
  0x98   : > { %v330_v43 = vrot.slane %v329_v42, 4 }
  0x99   : > { %v336_v44 = vsel %vm304_vm0, %v327_v41, 0.0 }
  0x9a   : > { %v331_v45 = vadd.f32 %v330_v43, %v329_v42  ;;  %v337_v46 = vrot.slane %v336_v44, 4 }
  0x9c   : > { %v332_v47 = vrot.slane %v331_v45, 2  ;;  %v338_v48 = vadd.f32 %v337_v46, %v336_v44 }
  0x9e   : > { %v705_v49 = vpop.eup %704  ;;  %v333_v50 = vadd.f32 %v332_v47, %v331_v45  ;;  %v339_v51 = vrot.slane %v338_v48, 2 }
  0x9f   : > { %v377_v52 = vcombine.high %v705_v49, %v705_v49  ;;  %v379_v53 = vsel %vm304_vm0, %v705_v49, 0.0 }
  0xa0   : > { %v340_v54 = vadd.f32 %v339_v51, %v338_v48  ;;  %v380_v55 = vrot.slane %v379_v53, 4  ;;  %v334_v56 = vrot.slane %v333_v50, 1 }
  0xa1   : > { %v386_v57 = vsel %vm304_vm0, %v377_v52, 0.0 }
  0xa2   : > { %v341_v58 = vrot.slane %v340_v54, 1  ;;  %v381_v59 = vadd.f32 %v380_v55, %v379_v53  ;;  %v387_v60 = vrot.slane %v386_v57, 4  ;;  %v335_v63 = vadd.f32 %v334_v56, %v333_v50 }
  0xa4   : > { %v382_v61 = vrot.slane %v381_v59, 2  ;;  %v388_v62 = vadd.f32 %v387_v60, %v386_v57  ;;  %v342_v0 = vadd.f32 %v341_v58, %v340_v54  ;;  %706 = vrcp.f32 %v335_v63 }
  0xa6   : > { %v383_v1 = vadd.f32 %v382_v61, %v381_v59  ;;  %v389_v2 = vrot.slane %v388_v62, 2  ;;  %708 = vrcp.f32 %v342_v0 }
  0xa8   : > { %v384_v3 = vrot.slane %v383_v1, 1  ;;  %v390_v4 = vadd.f32 %v389_v2, %v388_v62 }
  0xaa   : > { %v385_v5 = vadd.f32 %v384_v3, %v383_v1  ;;  %v391_v6 = vrot.slane %v390_v4, 1 }
  0xac   : > { %v392_v7 = vadd.f32 %v391_v6, %v390_v4  ;;  %710 = vlog2.f32 %v385_v5 }
  0xae   : > { %712 = vlog2.f32 %v392_v7  ;;  %v707_v8 = vpop.eup %706 }
  0xb0   : > { %v709_v9 = vpop.eup %708 }
  0xb1   : > { %v347_v11 = vcombine.low %v707_v8, %v709_v9 }
  0xb3   : > { %v349_v15 = vmul.f32 %v703_v40, %v347_v11 }
  0xb6   : > { %v711_v10 = vpop.eup %710 }
  0xb7   : > { %v394_v12 = vmul.f32 0.6931472, %v711_v10 }
  0xb8   : > { %v713_v13 = vpop.eup %712 }
  0xb9   : > { %v396_v14 = vmul.f32 0.6931472, %v713_v13 }
  0xbb   : > { %v399_v16 = vcombine.low %v394_v12, %v396_v14 }
  0xbd   : > { %v401_v17 = vsub.f32 %v373_v38, %v399_v16 }
  0xbf   : > { %v402_v18 = vmul.f32 %v401_v17, %v349_v15 }
  0xc1   : > { %v405_v19 = vcombine.high %v402_v18, %v402_v18  ;;  %v407_v20 = vsel %vm304_vm0, %v402_v18, 0.0  ;;  %403 = vst [vmem:[%s286_s30] sm:$0xff] %v402_v18 }
  0xc3   : > { %v408_v21 = vsel %vm304_vm0, %v405_v19, 0.0 }
  0xc4   : > { %v409_v22 = vadd.f32 %v408_v21, %v407_v20 }
  0xc6   : > { %410 = vadd.xlane.f32.xlu0 %v409_v22 }
  0xc7   : > { %800 = shalt.err (!%p797_p6)
}
  0xc8   : > { %s801_s18 = scalar_lea.hbm %s1145_s13, 128  ;;  %s805_s27 = scalar_lea.hbm %s1194_s3, 256 }
  0xc9   : > { %p802_p12 = scmp.ne.s32.totalorder %s1145_s13, %s801_s18  ;;  %p806_p8 = scmp.lt.u32.totalorder %s1145_s13, %s1194_s3 }
  0xca   : > { %p807_p10 = scmp.lt.u32.totalorder %s805_s27, %s801_s18  ;;  %p809_p1 = scmp.lt.u32.totalorder %s801_s18, %s1145_s13 }
  0xcb   : > { %p803_p13 = pnand %p802_p12, %p1221_p3 }
  0xcc   : > { %p808_p11 = por %p807_p10, %p806_p8 }
  0xcd   : > { %p804_p7 = pneg %p803_p13 }
  0xce   : > { %p810_p9 = por %p809_p1, %p808_p11 }
  0xd0   : > { %p811_p4 = pnand %p810_p9, %p804_p7 }
  0xd2   : > { %814 = shalt.err (!%p811_p4)
}
  0xd3   : > { %630 = dma.vmem_to_hbm [thread:$0]  (%p1221_p3), %s453_s10, 128, %s1145_s13, %s433_s21   ;;  %v427_v31 = vld [vmem:[%s1136_s14] sm:$0x1] }
 0x153   : > { %v411_v24 = vpop.xlane.xlu0 %410 }
 0x154   : > { %v412_v25 = vrot.slane %v411_v24, 4 }
 0x156   : > { %v413_v26 = vadd.f32 %v412_v25, %v411_v24 }
 0x158   : > { %v414_v27 = vrot.slane %v413_v26, 2 }
 0x15a   : > { %v415_v28 = vadd.f32 %v414_v27, %v413_v26 }
 0x15c   : > { %v416_v29 = vrot.slane %v415_v28, 1 }
 0x15e   : > { %v417_v30 = vadd.f32 %v416_v29, %v415_v28 }
 0x160   : > { %620 = vpush %v417_v30 }
 0x191   : > { %s621_s28 = spop %620 }
 0x192   : > { %s419_s6 = ssub.f32 0.0, %s621_s28 }
 0x194   : > { %s420_s30 = smul.f32 0.00390625, %s419_s6 }
 0x196   : > { %v428_v32 = vstv %s420_s30 }
 0x197   : > { %v429_v33 = vadd.f32 %v428_v32, %v427_v31 }
 0x199   : > { %431 = vst.msk [vmem:[%s1136_s14] sm:$0x1] %vm425_vm1, %v429_v33 }
 0x19a PF: > { %s467_s25 = sand.u32 1, %s857_s15   ;;  %p1222_p3 = scmp.ne.s32.totalorder %s1208_s26, 0 }
 0x19b   : > { %p1223_p5 = scmp.ge.s32.totalorder %s877_s20, 2  ;;  %s468_s8 = scalar_lea.sflag [#allocation4], %s467_s25 }
 0x19d   : > { %p644_p0 = pnand %p1223_p5, %p1222_p3 }
 0x19f   : > { %852 = dma.done.wait (!%p644_p0), %s468_s8, 128  }
 0x1a0   : > { %854 = vsyncadd (!%p644_p0), %s468_s8, 4294967168  ;;  %s25_s20 = sadd.s32 1, %s877_s20   ;;  %s1224_s10 = sld [smem:[#allocation14_spill]] }
 0x1a1   : > { %p22_p2 = scmp.ge.s32.totalorder %s25_s20, 4   ;;  %s1225_s15 = smov %s861_s16 }
 0x1a2   : > { %s1226_s16 = smov %s865_s17  ;;  %s1227_s17 = smov %s1031_s5 }
 0x1a3   : > { %s1228_s18 = smov %s873_s19  ;;  %24 = sbr.rel (!%p22_p2) target bundleno = 12 (0xc), region = 111 }
 0x1a6   : > { %s1229_s19 = smov %s1224_s10 }
 0x1aa   :  { %479 = vsyncpa [#allocation3], 1 }
 0x1ab   :  { %481 = vsyncpa [#allocation3 + $0x1], 1 }
 0x1ac   :  { %482 = vsyncpa [#allocation8], 1 }
 0x1ad   :  { %484 = vsyncpa [#allocation8 + $0x1], 1 }
 0x1ae   :  { %485 = vsyncpa [#allocation4], 1 }
 0x1af   :  { %487 = vsyncpa [#allocation4 + $0x1], 1 }
 0x1b0   :  { %488 = vsyncpa [#allocation5], 1 }
 0x1b1   :  { %490 = vsyncpa [#allocation5 + $0x1], 1 }

</bundles_post_ra>
